<compile_context>
chip_gen: v6e
topology: v6e:2x2x1
jax: 0.10.0
libtpu: 0.0.40
codegen_flags: <defaults>
</compile_context>

<pallas_src>
import jax
import jax.numpy as jnp
from jax.experimental import pallas as pl
from jax.experimental.pallas import tpu as pltpu


def _softplus(x):
    # numerically-stable softplus = log(1 + exp(x))
    return jnp.maximum(x, 0.0) + jnp.log1p(jnp.exp(-jnp.abs(x)))


def _round_up(x, m):
    return ((x + m - 1) // m) * m


def adaptive_dist_kernel(h_ref, wp_ref, bp_ref, wh_ref, bh_ref, eps_ref,
                         heads_ref, z_ref):
    d = z_ref.shape[-1]
    K = heads_ref.shape[-1] // 4

    # --- projection + dropout (identity, eval mode) ---------------------------
    # TODO(synk): nn.Dropout(0.1) training-mode stochastic masking not emitted.
    h = jnp.dot(h_ref[...], wp_ref[...],
                preferred_element_type=jnp.float32) + bp_ref[...]

    # --- single fused matmul + fused bias for all five heads ------------------
    # fused lane layout: [ z_mu (d) | z_sigma_raw (d) | w(K) | loc(K) | scale(K) | df(K) ]
    heads = jnp.dot(h.astype(jnp.bfloat16), wh_ref[...],
                    preferred_element_type=jnp.float32) + bh_ref[...]

    # --- latent z: reparameterized sample --------------------------------------
    z_mu = heads[:, :d]
    z_sigma = _softplus(heads[:, d:2 * d])
    z_ref[...] = z_mu + z_sigma * eps_ref[...]

    # --- four K-wide heads written into one lane-packed output slab -----------
    base = 2 * d
    logits = heads[:, base:base + K]
    locs = heads[:, base + K:base + 2 * K]
    scales_raw = heads[:, base + 2 * K:base + 3 * K]
    dfs_raw = heads[:, base + 3 * K:base + 4 * K]

    m = jnp.max(logits, axis=-1, keepdims=True)
    e = jnp.exp(logits - m)
    inv = pl.reciprocal(jnp.sum(e, axis=-1, keepdims=True), approx=True)

    heads_ref[:, 0 * K:1 * K] = e * inv                      # mixture weights
    heads_ref[:, 1 * K:2 * K] = locs                         # locs
    heads_ref[:, 2 * K:3 * K] = _softplus(scales_raw)        # scales
    heads_ref[:, 3 * K:4 * K] = _softplus(dfs_raw) + 2.0     # dfs


def adaptive_distribution_forward(h_t_flat, params, eps, *, tm=256):
    """h_t_flat: (M, 2*d_model), eps: (M, d_model). Returns 5 f32 arrays."""
    M, two_d = h_t_flat.shape
    d = two_d // 2
    K = params["ww"].shape[1]
    H = 2 * d + 4 * K

    # Fuse head weights / biases once on the host side (z section first).
    w_heads = jnp.concatenate(
        [params["wz"], params["ww"], params["wl"], params["ws"], params["wd"]],
        axis=1).astype(jnp.bfloat16)
    b_heads = jnp.concatenate(
        [params["bz"], params["bw"], params["bl"], params["bs"], params["bd"]],
        axis=1).astype(jnp.float32)
    wp = params["wp"].astype(jnp.bfloat16)
    bp = params["bp"].astype(jnp.float32)

    # Tile / pad the token dimension (tm multiple of 8, <= requested tile).
    tm = min(tm, _round_up(M, 8))
    Mp = _round_up(M, tm)
    h_bf = jnp.pad(h_t_flat.astype(jnp.bfloat16), ((0, Mp - M), (0, 0)))
    eps_p = jnp.pad(eps.astype(jnp.float32), ((0, Mp - M), (0, 0)))
    grid = (Mp // tm,)

    cost = pl.CostEstimate(
        flops=2 * Mp * (2 * d * d + d * H),
        transcendentals=Mp * (d + 3 * K + 1),
        bytes_accessed=(h_bf.size * 2 + eps_p.size * 4
                        + wp.size * 2 + w_heads.size * 2
                        + (bp.size + b_heads.size) * 4
                        + Mp * (4 * K + d) * 4),
    )

    heads_out, z = pl.pallas_call(
        adaptive_dist_kernel,
        out_shape=(jax.ShapeDtypeStruct((Mp, 4 * K), jnp.float32),
                   jax.ShapeDtypeStruct((Mp, d), jnp.float32)),
        grid_spec=pltpu.PrefetchScalarGridSpec(
            num_scalar_prefetch=0,
            grid=grid,
            in_specs=[
                pl.BlockSpec((tm, 2 * d), lambda i: (i, 0)),   # h_t tile (bf16)
                pl.BlockSpec((2 * d, d), lambda i: (0, 0)),    # wp (resident)
                pl.BlockSpec((1, d), lambda i: (0, 0)),        # bp
                pl.BlockSpec((d, H), lambda i: (0, 0)),        # fused head W
                pl.BlockSpec((1, H), lambda i: (0, 0)),        # fused head b
                pl.BlockSpec((tm, d), lambda i: (i, 0)),       # eps tile
            ],
            out_specs=(
                pl.BlockSpec((tm, 4 * K), lambda i: (i, 0)),   # fused K-heads
                pl.BlockSpec((tm, d), lambda i: (i, 0)),       # z
            ),
        ),
        compiler_params=pltpu.CompilerParams(
            dimension_semantics=("parallel",),
            vmem_limit_bytes=32 * 1024 * 1024),
        cost_estimate=cost,
    )(h_bf, wp, bp, w_heads, b_heads, eps_p)

    weights = heads_out[:M, 0 * K:1 * K]
    locs = heads_out[:M, 1 * K:2 * K]
    scales = heads_out[:M, 2 * K:3 * K]
    dfs = heads_out[:M, 3 * K:4 * K]
    return weights, locs, scales, dfs, z[:M]


def init_params(key, d_model, num_components):
    """Deterministic synthetic parameter init (Linear weights as (in, out))."""
    def lin(k, fan_in, fan_out):
        kw, kb = jax.random.split(k)
        w = jax.random.normal(kw, (fan_in, fan_out), jnp.float32) * 0.02
        b = jax.random.normal(kb, (1, fan_out), jnp.float32) * 0.02
        return w, b

    ks = jax.random.split(key, 6)
    wp, bp = lin(ks[0], 2 * d_model, d_model)
    ww, bw = lin(ks[1], d_model, num_components)
    wl, bl = lin(ks[2], d_model, num_components)
    ws, bs = lin(ks[3], d_model, num_components)
    wd, bd = lin(ks[4], d_model, num_components)
    wz, bz = lin(ks[5], d_model, 2 * d_model)
    return dict(wp=wp, bp=bp, ww=ww, bw=bw, wl=wl, bl=bl,
                ws=ws, bs=bs, wd=wd, bd=bd, wz=wz, bz=bz)


if __name__ == "__main__":
    B, S, d_model, K = 2, 8, 32, 3
    key = jax.random.PRNGKey(0)
    k_h, k_p, k_eps = jax.random.split(key, 3)

    # input: (B, S, 2*d_model), matching Linear(d_model*2, d_model) on last dim
    h_t = jax.random.normal(k_h, (B, S, 2 * d_model), jnp.float32)
    params = init_params(k_p, d_model, K)
    eps = jax.random.normal(k_eps, (B * S, d_model), jnp.float32)

    h_flat = h_t.reshape(B * S, 2 * d_model)
    weights, locs, scales, dfs, z = adaptive_distribution_forward(
        h_flat, params, eps)

    # reshape back to (B, S, ...) like the PyTorch module's trailing-dim semantics
    weights = weights.reshape(B, S, K)
    locs = locs.reshape(B, S, K)
    scales = scales.reshape(B, S, K)
    dfs = dfs.reshape(B, S, K)
    z = z.reshape(B, S, d_model)

    jax.block_until_ready((weights, locs, scales, dfs, z))

    # light sanity checks (bf16 matmuls + approx reciprocal => loose tolerance)
    assert weights.shape == (B, S, K) and z.shape == (B, S, d_model)
    assert bool(jnp.all(jnp.abs(weights.sum(-1) - 1.0) < 1e-2))
    assert bool(jnp.all(scales > 0)) and bool(jnp.all(dfs > 2))
    assert bool(jnp.all(jnp.isfinite(z)))

    print("KERNEL_OK")
</pallas_src>

<mosaic_0001>
module attributes {stable_mosaic.version = 11 : i64} {
  func.func @adaptive_dist_kernel(%arg0: i32, %arg1: memref<16x64xbf16, #tpu.memory_space<vmem>>, %arg2: memref<64x32xbf16, #tpu.memory_space<vmem>>, %arg3: memref<1x32xf32, #tpu.memory_space<vmem>>, %arg4: memref<32x76xbf16, #tpu.memory_space<vmem>>, %arg5: memref<1x76xf32, #tpu.memory_space<vmem>>, %arg6: memref<16x32xf32, #tpu.memory_space<vmem>>, %arg7: memref<16x12xf32, #tpu.memory_space<vmem>>, %arg8: memref<16x32xf32, #tpu.memory_space<vmem>>) attributes {dimension_semantics = [#tpu.dimension_semantics<parallel>], iteration_bounds = array<i64: 1>, scalar_prefetch = 0 : i64, scratch_operands = 0 : i64, tpu.core_type = #tpu.core_type<tc>, window_params = [{transform_indices = @transform_0, window_bounds = array<i64: 16, 64>}, {pipeline_mode = #tpu.pipeline_mode<synchronous>, transform_indices = @transform_1, window_bounds = array<i64: 64, 32>}, {pipeline_mode = #tpu.pipeline_mode<synchronous>, transform_indices = @transform_2, window_bounds = array<i64: 1, 32>}, {pipeline_mode = #tpu.pipeline_mode<synchronous>, transform_indices = @transform_3, window_bounds = array<i64: 32, 76>}, {pipeline_mode = #tpu.pipeline_mode<synchronous>, transform_indices = @transform_4, window_bounds = array<i64: 1, 76>}, {transform_indices = @transform_5, window_bounds = array<i64: 16, 32>}, {transform_indices = @transform_6, window_bounds = array<i64: 16, 12>}, {transform_indices = @transform_7, window_bounds = array<i64: 16, 32>}]} {
    %c0 = arith.constant 0 : index
    %c0_0 = arith.constant 0 : index
    %0 = vector.load %arg1[%c0, %c0_0] : memref<16x64xbf16, #tpu.memory_space<vmem>>, vector<16x64xbf16>
    %c0_1 = arith.constant 0 : index
    %c0_2 = arith.constant 0 : index
    %1 = vector.load %arg2[%c0_1, %c0_2] : memref<64x32xbf16, #tpu.memory_space<vmem>>, vector<64x32xbf16>
    %cst = arith.constant dense<0.000000e+00> : vector<16x32xf32>
    %2 = tpu.matmul %0, %1, %cst {dimension_numbers = #tpu.dot_dimension_numbers<[1], [0], [0], [1], [0, 0, 1, 1], [], []>} : vector<16x64xbf16>, vector<64x32xbf16>, vector<16x32xf32> -> vector<16x32xf32>
    %c0_3 = arith.constant 0 : index
    %c0_4 = arith.constant 0 : index
    %3 = vector.load %arg3[%c0_3, %c0_4] : memref<1x32xf32, #tpu.memory_space<vmem>>, vector<1x32xf32>
    %4 = vector.broadcast %3 : vector<1x32xf32> to vector<16x32xf32>
    %5 = arith.addf %2, %4 : vector<16x32xf32>
    %6 = arith.truncf %5 : vector<16x32xf32> to vector<16x32xbf16>
    %c0_5 = arith.constant 0 : index
    %c0_6 = arith.constant 0 : index
    %7 = vector.load %arg4[%c0_5, %c0_6] : memref<32x76xbf16, #tpu.memory_space<vmem>>, vector<32x76xbf16>
    %cst_7 = arith.constant dense<0.000000e+00> : vector<16x76xf32>
    %8 = tpu.matmul %6, %7, %cst_7 {dimension_numbers = #tpu.dot_dimension_numbers<[1], [0], [0], [1], [0, 0, 1, 1], [], []>} : vector<16x32xbf16>, vector<32x76xbf16>, vector<16x76xf32> -> vector<16x76xf32>
    %c0_8 = arith.constant 0 : index
    %c0_9 = arith.constant 0 : index
    %9 = vector.load %arg5[%c0_8, %c0_9] : memref<1x76xf32, #tpu.memory_space<vmem>>, vector<1x76xf32>
    %10 = vector.broadcast %9 : vector<1x76xf32> to vector<16x76xf32>
    %11 = arith.addf %8, %10 : vector<16x76xf32>
    %12 = vector.extract_strided_slice %11 {offsets = [0, 0], sizes = [16, 32], strides = [1, 1]} : vector<16x76xf32> to vector<16x32xf32>
    %13 = vector.extract_strided_slice %11 {offsets = [0, 32], sizes = [16, 32], strides = [1, 1]} : vector<16x76xf32> to vector<16x32xf32>
    %cst_10 = arith.constant 0.000000e+00 : f32
    %14 = vector.broadcast %cst_10 : f32 to vector<16x32xf32>
    %15 = arith.maximumf %13, %14 : vector<16x32xf32>
    %16 = math.absf %13 : vector<16x32xf32>
    %cst_11 = arith.constant 0.000000e+00 : f32
    %17 = vector.broadcast %cst_11 : f32 to vector<16x32xf32>
    %18 = arith.subf %17, %16 : vector<16x32xf32>
    %19 = math.exp %18 : vector<16x32xf32>
    %20 = math.log1p %19 : vector<16x32xf32>
    %21 = arith.addf %15, %20 : vector<16x32xf32>
    %c0_12 = arith.constant 0 : index
    %c0_13 = arith.constant 0 : index
    %22 = vector.load %arg6[%c0_12, %c0_13] : memref<16x32xf32, #tpu.memory_space<vmem>>, vector<16x32xf32>
    %23 = arith.mulf %21, %22 : vector<16x32xf32>
    %24 = arith.addf %12, %23 : vector<16x32xf32>
    %c0_14 = arith.constant 0 : index
    %c0_15 = arith.constant 0 : index
    %25 = vector.load %arg8[%c0_14, %c0_15] : memref<16x32xf32, #tpu.memory_space<vmem>>, vector<16x32xf32>
    tpu.vector_store %arg8[%c0_14, %c0_15], %24 {strides = array<i32>} : memref<16x32xf32, #tpu.memory_space<vmem>>, vector<16x32xf32>,
    %26 = vector.extract_strided_slice %11 {offsets = [0, 64], sizes = [16, 3], strides = [1, 1]} : vector<16x76xf32> to vector<16x3xf32>
    %27 = vector.extract_strided_slice %11 {offsets = [0, 67], sizes = [16, 3], strides = [1, 1]} : vector<16x76xf32> to vector<16x3xf32>
    %28 = vector.extract_strided_slice %11 {offsets = [0, 70], sizes = [16, 3], strides = [1, 1]} : vector<16x76xf32> to vector<16x3xf32>
    %29 = vector.extract_strided_slice %11 {offsets = [0, 73], sizes = [16, 3], strides = [1, 1]} : vector<16x76xf32> to vector<16x3xf32>
    %cst_16 = arith.constant dense<0xFF800000> : vector<16xf32>
    %30 = vector.multi_reduction <maximumf>, %26, %cst_16 [1] : vector<16x3xf32> to vector<16xf32>
    %31 = vector.shape_cast %30 : vector<16xf32> to vector<16x1xf32>
    %32 = vector.broadcast %31 : vector<16x1xf32> to vector<16x3xf32>
    %33 = arith.subf %26, %32 : vector<16x3xf32>
    %34 = math.exp %33 : vector<16x3xf32>
    %cst_17 = arith.constant dense<0.000000e+00> : vector<16xf32>
    %35 = vector.multi_reduction <add>, %34, %cst_17 [1] : vector<16x3xf32> to vector<16xf32>
    %36 = vector.shape_cast %35 : vector<16xf32> to vector<16x1xf32>
    %37 = tpu.reciprocal %36 {approx = true} : vector<16x1xf32> -> vector<16x1xf32>
    %38 = vector.broadcast %37 : vector<16x1xf32> to vector<16x3xf32>
    %39 = arith.mulf %34, %38 : vector<16x3xf32>
    %c0_18 = arith.constant 0 : index
    %c0_19 = arith.constant 0 : index
    %40 = vector.load %arg7[%c0_18, %c0_19] : memref<16x12xf32, #tpu.memory_space<vmem>>, vector<16x3xf32>
    tpu.vector_store %arg7[%c0_18, %c0_19], %39 {strides = array<i32>} : memref<16x12xf32, #tpu.memory_space<vmem>>, vector<16x3xf32>,
    %c0_20 = arith.constant 0 : index
    %c3 = arith.constant 3 : index
    %41 = vector.load %arg7[%c0_20, %c3] : memref<16x12xf32, #tpu.memory_space<vmem>>, vector<16x3xf32>
    tpu.vector_store %arg7[%c0_20, %c3], %27 {strides = array<i32>} : memref<16x12xf32, #tpu.memory_space<vmem>>, vector<16x3xf32>,
    %cst_21 = arith.constant 0.000000e+00 : f32
    %42 = vector.broadcast %cst_21 : f32 to vector<16x3xf32>
    %43 = arith.maximumf %28, %42 : vector<16x3xf32>
    %44 = math.absf %28 : vector<16x3xf32>
    %cst_22 = arith.constant 0.000000e+00 : f32
    %45 = vector.broadcast %cst_22 : f32 to vector<16x3xf32>
    %46 = arith.subf %45, %44 : vector<16x3xf32>
    %47 = math.exp %46 : vector<16x3xf32>
    %48 = math.log1p %47 : vector<16x3xf32>
    %49 = arith.addf %43, %48 : vector<16x3xf32>
    %c0_23 = arith.constant 0 : index
    %c6 = arith.constant 6 : index
    %50 = vector.load %arg7[%c0_23, %c6] : memref<16x12xf32, #tpu.memory_space<vmem>>, vector<16x3xf32>
    tpu.vector_store %arg7[%c0_23, %c6], %49 {strides = array<i32>} : memref<16x12xf32, #tpu.memory_space<vmem>>, vector<16x3xf32>,
    %cst_24 = arith.constant 0.000000e+00 : f32
    %51 = vector.broadcast %cst_24 : f32 to vector<16x3xf32>
    %52 = arith.maximumf %29, %51 : vector<16x3xf32>
    %53 = math.absf %29 : vector<16x3xf32>
    %cst_25 = arith.constant 0.000000e+00 : f32
    %54 = vector.broadcast %cst_25 : f32 to vector<16x3xf32>
    %55 = arith.subf %54, %53 : vector<16x3xf32>
    %56 = math.exp %55 : vector<16x3xf32>
    %57 = math.log1p %56 : vector<16x3xf32>
    %58 = arith.addf %52, %57 : vector<16x3xf32>
    %cst_26 = arith.constant 2.000000e+00 : f32
    %59 = vector.broadcast %cst_26 : f32 to vector<16x3xf32>
    %60 = arith.addf %58, %59 : vector<16x3xf32>
    %c0_27 = arith.constant 0 : index
    %c9 = arith.constant 9 : index
    %61 = vector.load %arg7[%c0_27, %c9] : memref<16x12xf32, #tpu.memory_space<vmem>>, vector<16x3xf32>
    tpu.vector_store %arg7[%c0_27, %c9], %60 {strides = array<i32>} : memref<16x12xf32, #tpu.memory_space<vmem>>, vector<16x3xf32>,
    return
  }
  func.func @transform_0(%arg0: i32) -> (i32, i32) {
    %c0_i32 = arith.constant 0 : i32
    %c0_i32_0 = arith.constant 0 : i32
    return %arg0, %c0_i32 : i32, i32
  }
  func.func @transform_1(%arg0: i32) -> (i32, i32) {
    %c0_i32 = arith.constant 0 : i32
    %c0_i32_0 = arith.constant 0 : i32
    %c0_i32_1 = arith.constant 0 : i32
    return %c0_i32, %c0_i32_0 : i32, i32
  }
  func.func @transform_2(%arg0: i32) -> (i32, i32) {
    %c0_i32 = arith.constant 0 : i32
    %c0_i32_0 = arith.constant 0 : i32
    %c0_i32_1 = arith.constant 0 : i32
    return %c0_i32, %c0_i32_0 : i32, i32
  }
  func.func @transform_3(%arg0: i32) -> (i32, i32) {
    %c0_i32 = arith.constant 0 : i32
    %c0_i32_0 = arith.constant 0 : i32
    %c0_i32_1 = arith.constant 0 : i32
    return %c0_i32, %c0_i32_0 : i32, i32
  }
  func.func @transform_4(%arg0: i32) -> (i32, i32) {
    %c0_i32 = arith.constant 0 : i32
    %c0_i32_0 = arith.constant 0 : i32
    %c0_i32_1 = arith.constant 0 : i32
    return %c0_i32, %c0_i32_0 : i32, i32
  }
  func.func @transform_5(%arg0: i32) -> (i32, i32) {
    %c0_i32 = arith.constant 0 : i32
    %c0_i32_0 = arith.constant 0 : i32
    return %arg0, %c0_i32 : i32, i32
  }
  func.func @transform_6(%arg0: i32) -> (i32, i32) {
    %c0_i32 = arith.constant 0 : i32
    %c0_i32_0 = arith.constant 0 : i32
    return %arg0, %c0_i32 : i32, i32
  }
  func.func @transform_7(%arg0: i32) -> (i32, i32) {
    %c0_i32 = arith.constant 0 : i32
    %c0_i32_0 = arith.constant 0 : i32
    return %arg0, %c0_i32 : i32, i32
  }
}

</mosaic_0001>

<bundles_post_ra>
// kernel: tpu_custom_call.1
= control target key start
LH: loop header
LB: loop body
LE: loop exit
PB: predicated region body
PF: predicated region fallthrough
CT: control target
= control target key end

     0   :  { %13 = vsyncpa [#allocation3], 0  ;;  %v466_v1 = vmov 0.0   ;;  %vm467_vm0 = vmmov 0   ;;  %s601_s0 = inlined_call_operand.vmem [shape: bf16[16,64], index: 0, kind: input, shape index: {}]   ;;  %s602_s1 = inlined_call_operand.vmem [shape: bf16[64,32], index: 1, kind: input, shape index: {}]   ;;  %s603_s2 = inlined_call_operand.vmem [shape: f32[1,32], index: 2, kind: input, shape index: {}]   ;;  %s604_s3 = inlined_call_operand.vmem [shape: bf16[32,76], index: 3, kind: input, shape index: {}]   ;;  %s605_s4 = inlined_call_operand.vmem [shape: f32[1,76], index: 4, kind: input, shape index: {}]   ;;  %s606_s5 = inlined_call_operand.vmem [shape: f32[16,32], index: 5, kind: input, shape index: {}]   ;;  %s607_s6 = inlined_call_operand.hbm [shape: f32[16,12], index: 6, kind: output, shape index: {0}]   ;;  %s608_s7 = inlined_call_operand.hbm [shape: f32[16,32], index: 7, kind: output, shape index: {1}]  }
   0x1   :  { %v399_v0 = vld [vmem:[%s602_s1 + $0x18] sm:$0xff]   ;;  %370 = vmatprep.subr.bf16.mxu0 %v466_v1  ;;  %382 = vmatprep.subr.bf16.mxu1 %v466_v1  ;;  %v400_v2 = vld [vmem:[%s602_s1 + $0x10] sm:$0xff]   ;;  %v401_v3 = vld [vmem:[%s602_s1 + $0x8] sm:$0xff]  }
   0x2   :  { %371 = vmatpush3.bf16.msra.mxu0 %v399_v0  ;;  %378 = vmatprep.mubr.msk.bf16.mxu0 %vm467_vm0, %v466_v1 }
   0x3   :  { %372 = vmatprep.subr.bf16.mxu0 %v466_v1  ;;  %386 = vmatprep.mubr.msk.bf16.mxu1 %vm467_vm0, %v466_v1 }
   0x6   :  { %373 = vmatpush3.bf16.msra.mxu0 %v400_v2 }
   0x7   :  { %14 = vsyncpa [#allocation5], 0  ;;  %374 = vmatprep.subr.bf16.mxu0 %v466_v1  ;;  %v402_v4 = vld [vmem:[%s602_s1] sm:$0xff]   ;;  %vm74_vm1 = vcmask 523264   ;;  %v404_v6 = vld [vmem:[%s604_s3 + $0x8] sm:$0xff]   ;;  %vm143_vm2 = vcmask 261120  }
   0x8   :  { %v403_v5 = vld [vmem:[%s601_s0] sm:$0xff]   ;;  %383 = vmatpush3.bf16.msra.mxu1 %v404_v6  ;;  %vm242_vm3 = vcmask 548352   ;;  %vm263_vm4 = vcmask 23552   ;;  %s469_s17 = smov 32   ;;  %v219_v38 = vld [vmem:[%s606_s5 + $0x8] sm:$0xff]  ;;  %s471_s20 = smov [#allocation4]  }
   0x9   :  { %384 = vmatprep.subr.bf16.mxu1 %v466_v1  ;;  %v405_v7 = vld [vmem:[%s604_s3] sm:$0xff]   ;;  %s336_s21 = sshll.u32 %s471_s20, 4  ;;  %s337_s21 = int_to_ptr.vmem [resolvable:$true] %s336_s21 }
   0xa   :  { %375 = vmatpush3.bf16.msra.mxu0 %v401_v3  ;;  %v351_v9 = vld [vmem:[%s603_s2] ss:$0 sm:$0xff]  ;;  %s468_s2 = smov 64   ;;  %s422_s22 = scalar_lea.vmem %s337_s21, 256 }
   0xb   :  { %376 = vmatprep.subr.bf16.mxu0 %v466_v1  ;;  %v358_v16 = vld [vmem:[%s605_s4] ss:$0 sm:$0xff]  ;;  %p423_p0 = scmp.ne.s32.totalorder %s337_s21, %s422_s22  ;;  %p427_p1 = scmp.lt.s32.totalorder %s337_s21, %s337_s21 }
   0xc   :  { %385 = vmatpush3.bf16.msra.mxu1 %v405_v7  ;;  %v218_v37 = vld [vmem:[%s606_s5] sm:$0xff]  ;;  %s470_s5 = smov 96   ;;  %p428_p2 = scmp.lt.s32.totalorder %s422_s22, %s422_s22 }
   0xe   :  { %377 = vmatpush3.bf16.msra.mxu0 %v402_v4  ;;  %p429_p3 = por %p428_p2, %p427_p1 }
  0x10   :  { %p430_p4 = pnand %p429_p3, %p423_p0 }
  0x11   :  { %379 = vmatmul.mubr.msk.bf16.vlgmr.msra.gmra.mxu0 %vm74_vm1, %v403_v5 }
  0xd1   :  { %v112_v8 = vpop.f32.mrf.mxu0 }
  0xd2   :  { %v113_v12 = vadd.f32 %v351_v9, %v112_v8 }
  0xd3   :  { %v380_v10 = vpop.f32.mrf.mxu0 }
  0xd5   :  { %v115_v11 = vpop.f32.mrf.mxu0 }
  0xd6   :  { %v116_v13 = vadd.f32 %v351_v9, %v115_v11 }
  0xd7   :  { %v381_v14 = vpop.f32.mrf.mxu0 }
  0xd8   :  { %v119_v15 = vpack.c.bf16 %v116_v13, %v113_v12 }
  0xda   :  { %387 = vmatmul.mubr.msk.bf16.vlgmr.msra.gmra.mxu1 %vm143_vm2, %v119_v15 }
 0x19a   :  { %v181_v17 = vpop.f32.mrf.mxu1 }
 0x19b   :  { %v543_v18 = vadd.f32 %v358_v16, %v181_v17 }
 0x19c   :  { %v388_v19 = vpop.f32.mrf.mxu1 }
 0x19d   :  { %v243_v20 = vsel %vm242_vm3, %v543_v18, -inf  ;;  %v190_v39 = vand.u32 2147483647, %v543_v18  ;;  %v188_v62 = vmax.f32 %v543_v18, 0.0 }
 0x19e   :  { %244 = vmax.xlane.f32.xlu0 %v243_v20  ;;  %v184_v21 = vpop.f32.mrf.mxu1 }
 0x19f   :  { %v546_v22 = vadd.f32 %v358_v16, %v184_v21  ;;  %v192_v40 = vsub.f32 0.0, %v190_v39 }
 0x1a0   :  { %v389_v23 = vpop.f32.mrf.mxu1 }
 0x1a1   :  { %v246_v24 = vsel %vm242_vm3, %v546_v22, -inf  ;;  %v191_v41 = vand.u32 2147483647, %v546_v22  ;;  %v194_v42 = vmul.f32 1.442695, %v192_v40  ;;  %v189_v4 = vmax.f32 %v546_v22, 0.0 }
 0x1a2   :  { %247 = vmax.xlane.f32.xlu0 %v246_v24 }
 0x1a3   :  { %v193_v43 = vsub.f32 0.0, %v191_v41 }
 0x1a5   :  { %v196_v44 = vmul.f32 1.442695, %v193_v43 }
 0x227   :  { %v245_v25 = vpop.xlane.xlu0 %244 }
 0x228   :  { %v249_v26 = vsub.f32 %v543_v18, %v245_v25 }
 0x22a   :  { %v251_v27 = vmul.f32 1.442695, %v249_v26 }
 0x22b   :  { %v248_v28 = vpop.xlane.xlu0 %247 }
 0x22c   :  { %406 = vpow2.f32 %v251_v27  ;;  %v250_v29 = vsub.f32 %v546_v22, %v248_v28 }
 0x22e   :  { %v253_v30 = vmul.f32 1.442695, %v250_v29 }
 0x230   :  { %408 = vpow2.f32 %v253_v30 }
 0x231   :  { %410 = vpow2.f32 %v194_v42 }
 0x232   :  { %412 = vpow2.f32 %v196_v44 }
 0x239   :  { %v551_v31 = vpop.eup %406 }
 0x23a   :  { %257 = vrot.lane.b32.xlu1 %v551_v31, %s468_s2 }
 0x23d   :  { %v555_v32 = vpop.eup %408 }
 0x23e   :  { %259 = vrot.lane.b32.xlu1 %v555_v32, %s468_s2  ;;  %v411_v45 = vpop.eup %410 }
 0x23f   :  { %v198_v46 = vadd.f32 1.0, %v411_v45  ;;  %v413_v47 = vpop.eup %412  ;;  %v201_v49 = vmul.f32 -0.5, %v411_v45  ;;  %v204_v53 = vand.u32 2147483647, %v411_v45 }
 0x240   :  { %v207_v48 = vadd.f32 1.0, %v413_v47  ;;  %v210_v52 = vmul.f32 -0.5, %v413_v47  ;;  %v213_v58 = vand.u32 2147483647, %v413_v47 }
 0x241   :  { %414 = vlog2.f32 %v198_v46  ;;  %v202_v51 = vadd.f32 1.0, %v201_v49  ;;  %vm205_vm5 = vcmp.lt.f32.partialorder %v204_v53, 0.0004427343 }
 0x242   :  { %416 = vlog2.f32 %v207_v48  ;;  %v211_v57 = vadd.f32 1.0, %v210_v52  ;;  %vm214_vm6 = vcmp.lt.f32.partialorder %v213_v58, 0.0004427343 }
 0x243   :  { %v203_v56 = vmul.f32 %v411_v45, %v202_v51 }
 0x244   :  { %v212_v63 = vmul.f32 %v413_v47, %v211_v57 }
 0x24e   :  { %v415_v50 = vpop.eup %414 }
 0x24f   :  { %v200_v54 = vmul.f32 0.6931472, %v415_v50  ;;  %v417_v55 = vpop.eup %416 }
 0x250   :  { %v209_v61 = vmul.f32 0.6931472, %v417_v55 }
 0x251   :  { %v206_v60 = vsel %vm205_vm5, %v203_v56, %v200_v54 }
 0x252   :  { %v216_v0 = vadd.f32 %v206_v60, %v188_v62  ;;  %v215_v2 = vsel %vm214_vm6, %v212_v63, %v209_v61 }
 0x253   :  { %v217_v5 = vadd.f32 %v215_v2, %v189_v4 }
 0x254   :  { %v306_v14 = vadd.f32 2.0, %v216_v0 }
 0x255   :  { %v307_v9 = vadd.f32 2.0, %v217_v5 }
 0x2ac   :  { %v258_v33 = vpop.permute.xlu1 %257 }
 0x2ad   :  { %v264_v34 = vsel %vm263_vm4, %v258_v33, 0.0 }
 0x2ae   :  { %265 = vadd.xlane.f32.xlu0 %v264_v34 }
 0x2b0   :  { %v260_v35 = vpop.permute.xlu1 %259 }
 0x2b1   :  { %v267_v36 = vsel %vm263_vm4, %v260_v35, 0.0 }
 0x2b2   :  { %268 = vadd.xlane.f32.xlu1 %v267_v36 }
 0x2c4   :  { %222 = vrot.lane.b32.xlu0 %v218_v37, %s469_s17 }
 0x2c8   :  { %224 = vrot.lane.b32.xlu0 %v219_v38, %s469_s17 }
 0x337   :  { %v266_v59 = vpop.xlane.xlu0 %265 }
 0x338   :  { %418 = vrcp.f32 %v266_v59 }
 0x33b   :  { %v223_v1 = vpop.permute.xlu0 %222  ;;  %v269_v8 = vpop.xlane.xlu1 %268 }
 0x33c   :  { %v228_v3 = vmul.f32 %v223_v1, %v216_v0  ;;  %420 = vrcp.f32 %v269_v8 }
 0x33e   :  { %232 = vrot.lane.b32.xlu1 %v228_v3, %s470_s5 }
 0x33f   :  { %v225_v6 = vpop.permute.xlu0 %224 }
 0x340   :  { %v229_v7 = vmul.f32 %v225_v6, %v217_v5 }
 0x342   :  { %299 = vrot.lane.b32.xlu1 %v217_v5, %s468_s2  ;;  %234 = vrot.lane.b32.xlu0 %v229_v7, %s470_s5 }
 0x345   :  { %v419_v10 = vpop.eup %418 }
 0x346   :  { %312 = vrot.lane.b32.xlu1 %v307_v9, %s468_s2  ;;  %286 = vrot.lane.b32.xlu0 %v543_v18, %s468_s2  ;;  %v272_v11 = vmul.f32 %v419_v10, %v551_v31 }
 0x349   :  { %v421_v12 = vpop.eup %420 }
 0x34a   :  { %288 = vrot.lane.b32.xlu0 %v546_v22, %s468_s2  ;;  %v273_v13 = vmul.f32 %v421_v12, %v555_v32 }
 0x34e   :  { %297 = vrot.lane.b32.xlu0 %v216_v0, %s468_s2 }
 0x352   :  { %276 = vrot.lane.b32.xlu0 %v272_v11, %s468_s2 }
 0x356   :  { %278 = vrot.lane.b32.xlu0 %v273_v13, %s468_s2 }
 0x35a   :  { %310 = vrot.lane.b32.xlu0 %v306_v14, %s468_s2 }
 0x3b0   :  { %v233_v15 = vpop.permute.xlu1 %232 }
 0x3b1   :  { %v238_v16 = vadd.f32 %v233_v15, %v543_v18 }
 0x3b3   :  { %240 = vst.msk [vmem:[#allocation4] sm:$0xff] %vm143_vm2, %v238_v16 }
 0x3b4   :  { %v235_v17 = vpop.permute.xlu0 %234 }
 0x3b5   :  { %v239_v19 = vadd.f32 %v235_v17, %v546_v22 }
 0x3b7   :  { %241 = vst.msk [vmem:[#allocation4 + $0x8] sm:$0xff] %vm143_vm2, %v239_v19 }
 0x3b8   :  { %v287_v20 = vpop.permute.xlu0 %286 }
 0x3b9   :  { %433 = shalt.err (!%p430_p4)
}
 0x3ba   :  { %s472_s23 = smov 128   ;;  %s473_s24 = smov 8   ;;  %vm292_vm7 = vcmask 48152   ;;  %vm303_vm8 = vcmask 72752   ;;  %v300_v23 = vpop.permute.xlu1 %299  ;;  %vm316_vm9 = vcmask 97352  }
 0x3bb   :  { %342 = dma.vmem_to_hbm [thread:$0]  %s337_s21, 256, %s608_s7, [#allocation5], %s472_s23, %s472_s23, %s473_s24  }
 0x3bc   :  { %v289_v18 = vpop.permute.xlu0 %288  ;;  %s474_s27 = smov [#allocation2]  }
 0x3bd   :  { %s324_s28 = sshll.u32 %s474_s27, 4  ;;  %s325_s28 = int_to_ptr.vmem [resolvable:$true] %s324_s28 }
 0x3be   :  { %v313_v25 = vpop.permute.xlu1 %312  ;;  %s442_s7 = scalar_lea.vmem %s325_s28, 256  ;;  %p447_p6 = scmp.lt.s32.totalorder %s325_s28, %s325_s28 }
 0x3bf   :  { %p443_p5 = scmp.ne.s32.totalorder %s325_s28, %s442_s7  ;;  %p448_p7 = scmp.lt.s32.totalorder %s442_s7, %s442_s7 }
 0x3c0   :  { %v298_v21 = vpop.permute.xlu0 %297 }
 0x3c1   :  { %p449_p8 = por %p448_p7, %p447_p6 }
 0x3c3   :  { %p450_p9 = pnand %p449_p8, %p443_p5 }
 0x3c4   :  { %v277_v22 = vpop.permute.xlu0 %276 }
 0x3c5   :  { %282 = vst.msk [vmem:[#allocation2] sm:$0xff] %vm263_vm4, %v277_v22 }
 0x3c6   :  { %293 = vst.msk [vmem:[#allocation2] sm:$0xff] %vm292_vm7, %v287_v20 }
 0x3c7   :  { %304 = vst.msk [vmem:[#allocation2] sm:$0xff] %vm303_vm8, %v298_v21 }
 0x3c8   :  { %v279_v24 = vpop.permute.xlu0 %278 }
 0x3c9   :  { %283 = vst.msk [vmem:[#allocation2 + $0x8] sm:$0xff] %vm263_vm4, %v279_v24 }
 0x3ca   :  { %294 = vst.msk [vmem:[#allocation2 + $0x8] sm:$0xff] %vm292_vm7, %v289_v18 }
 0x3cb   :  { %305 = vst.msk [vmem:[#allocation2 + $0x8] sm:$0xff] %vm303_vm8, %v300_v23 }
 0x3cc   :  { %v311_v26 = vpop.permute.xlu0 %310  ;;  %318 = vst.msk [vmem:[#allocation2 + $0x8] sm:$0xff] %vm316_vm9, %v313_v25 }
 0x3cd   :  { %317 = vst.msk [vmem:[#allocation2] sm:$0xff] %vm316_vm9, %v311_v26 }
 0x3ce   :  { %453 = shalt.err (!%p450_p9)
}
 0x3cf   :  { %330 = dma.vmem_to_hbm [thread:$0]  %s325_s28, 256, %s607_s6, [#allocation3], %s472_s23, %s472_s23, %s473_s24  }
 0x3d0   :  { %462 = dma.done.wait [#allocation3], 256  }
 0x3d1   :  { %463 = vsyncadd [#allocation3], 4294967040 }
 0x3d2   :  { %464 = dma.done.wait [#allocation5], 256  }
 0x3d3   :  { %465 = vsyncadd [#allocation5], 4294967040 }
 0x3d4   :  { %349 = vsyncpa [#allocation3], 1 }
 0x3d5   :  { %350 = vsyncpa [#allocation5], 1 }

</bundles_post_ra>
